<compile_context>
chip_gen: v7x
topology: tpu7x:2x2x1
jax: 0.10.0
libtpu: 0.0.40
codegen_flags: <defaults>
</compile_context>

<pallas_src>
import jax
import jax.numpy as jnp
from jax.experimental import pallas as pl
from jax.experimental.pallas import tpu as pltpu


def _gather_row_kernel(idx_ref, w_row_ref, out_ref):
    """One grid step copies one gathered embedding row to its output slot.

    idx_ref   : (N,)      int32  in SMEM (scalar prefetch; consumed by the
                                  index_maps, unused in the body)
    w_row_ref : (1, 1, D) float32 embedding row selected by the index_map
    out_ref   : (1, 1, D) float32 output row for node pl.program_id(0)
    """
    del idx_ref  # only needed by the index_maps
    out_ref[...] = w_row_ref[...]


def onehot_feature_encoder(node_label_index, emb_weight):
    """node_label_index: (N,) int, emb_weight: (C, D) f32 -> (N, D) f32."""
    n = node_label_index.shape[0]
    c, d = emb_weight.shape
    idx = node_label_index.astype(jnp.int32)          # SMEM scalar-prefetch arg
    w3 = emb_weight.reshape(c, 1, d)                  # free reshape (bitcast)

    itemsize = jnp.dtype(emb_weight.dtype).itemsize
    cost = pl.CostEstimate(
        flops=0,
        transcendentals=0,
        # read N gathered rows + write N output rows + read N int32 indices
        bytes_accessed=2 * n * d * itemsize + n * 4,
    )

    out3 = pl.pallas_call(
        _gather_row_kernel,
        out_shape=jax.ShapeDtypeStruct((n, 1, d), emb_weight.dtype),
        grid_spec=pltpu.PrefetchScalarGridSpec(
            num_scalar_prefetch=1,            # -> idx lands in SMEM, feeds index_maps
            grid=(n,),                        # one node per grid step
            in_specs=[
                # Data-dependent gather: DMA only row idx[i] of the table.
                pl.BlockSpec((1, 1, d), lambda i, idx_ref: (idx_ref[i], 0, 0)),
            ],
            out_specs=pl.BlockSpec((1, 1, d), lambda i, idx_ref: (i, 0, 0)),
        ),
        compiler_params=pltpu.CompilerParams(
            dimension_semantics=("parallel",),   # nodes are independent
        ),
        cost_estimate=cost,
    )(idx, w3)

    return out3.reshape(n, d)


def xavier_uniform(key, shape, dtype=jnp.float32):
    """Matches torch.nn.init.xavier_uniform_ for a 2-D weight."""
    fan_in, fan_out = shape[1], shape[0]   # Embedding weight: (num_emb, dim)
    bound = (6.0 / (fan_in + fan_out)) ** 0.5
    return jax.random.uniform(key, shape, dtype, minval=-bound, maxval=bound)


if __name__ == "__main__":
    num_classes = 16
    emb_dim = 32
    num_nodes = 8

    key = jax.random.PRNGKey(0)
    k_w, k_idx = jax.random.split(key)

    # Deterministic parameter init (module __init__: Embedding + xavier_uniform).
    emb_weight = xavier_uniform(k_w, (num_classes, emb_dim))

    # batch.node_label_index: int node labels in [0, num_classes)
    node_label_index = jax.random.randint(
        k_idx, (num_nodes,), 0, num_classes, dtype=jnp.int32
    )

    node_feature = onehot_feature_encoder(node_label_index, emb_weight)
    node_feature = jax.block_until_ready(node_feature)

    # Reference check: plain JAX embedding lookup (pure gather -> bit-exact).
    ref = emb_weight[node_label_index]
    assert node_feature.shape == (num_nodes, emb_dim)
    assert node_feature.dtype == jnp.float32
    assert jnp.array_equal(node_feature, ref), "mismatch vs reference"

    print("KERNEL_OK")
</pallas_src>

<mosaic_0001>
module attributes {stable_mosaic.version = 11 : i64} {
  func.func @_gather_row_kernel(%arg0: i32, %arg1: memref<8xi32, #tpu.memory_space<smem>>, %arg2: memref<1x1x32xf32, #tpu.memory_space<vmem>>, %arg3: memref<1x1x32xf32, #tpu.memory_space<vmem>>) attributes {dimension_semantics = [#tpu.dimension_semantics<parallel>], iteration_bounds = array<i64: 8>, scalar_prefetch = 1 : i64, scratch_operands = 0 : i64, tpu.core_type = #tpu.core_type<tc>, window_params = [{transform_indices = @transform_0, window_bounds = array<i64: 1, 1, 32>}, {transform_indices = @transform_1, window_bounds = array<i64: 1, 1, 32>}]} {
    %c0 = arith.constant 0 : index
    %c0_0 = arith.constant 0 : index
    %c0_1 = arith.constant 0 : index
    %0 = vector.load %arg2[%c0, %c0_0, %c0_1] : memref<1x1x32xf32, #tpu.memory_space<vmem>>, vector<1x1x32xf32>
    %c0_2 = arith.constant 0 : index
    %c0_3 = arith.constant 0 : index
    %c0_4 = arith.constant 0 : index
    %1 = vector.load %arg3[%c0_2, %c0_3, %c0_4] : memref<1x1x32xf32, #tpu.memory_space<vmem>>, vector<1x1x32xf32>
    tpu.vector_store %arg3[%c0_2, %c0_3, %c0_4], %0 {strides = array<i32>} : memref<1x1x32xf32, #tpu.memory_space<vmem>>, vector<1x1x32xf32>,
    return
  }
  func.func @transform_0(%arg0: i32, %arg1: memref<8xi32, #tpu.memory_space<smem>>) -> (i32, i32, i32) {
    %0 = arith.index_cast %arg0 : i32 to index
    %1 = memref.load %arg1[%0] : memref<8xi32, #tpu.memory_space<smem>>
    %c0_i32 = arith.constant 0 : i32
    %c0_i32_0 = arith.constant 0 : i32
    %c0_i32_1 = arith.constant 0 : i32
    return %1, %c0_i32, %c0_i32_0 : i32, i32, i32
  }
  func.func @transform_1(%arg0: i32, %arg1: memref<8xi32, #tpu.memory_space<smem>>) -> (i32, i32, i32) {
    %c0_i32 = arith.constant 0 : i32
    %c0_i32_0 = arith.constant 0 : i32
    %c0_i32_1 = arith.constant 0 : i32
    return %arg0, %c0_i32, %c0_i32_0 : i32, i32, i32
  }
}

</mosaic_0001>

<bundles_post_ra>
// kernel: tpu_custom_call.1
= control target key start
LH: loop header
LB: loop body
LE: loop exit
PB: predicated region body
PF: predicated region fallthrough
CT: control target
= control target key end

     0   :  { %s655_s0 = inlined_call_operand.hbm [shape: s32[8], index: 0, kind: input, shape index: {}]   ;;  %s656_s1 = inlined_call_operand.hbm [shape: f32[16,1,32], index: 1, kind: input, shape index: {}]   ;;  %s657_s2 = inlined_call_operand.hbm [shape: f32[8,1,32], index: 2, kind: output, shape index: {}]  }
   0x1   :  { %s299_s11 = scalar_lea.hbm %s655_s0, 16 }
   0x2   :  { %p300_p0 = scmp.ne.s32.totalorder %s655_s0, %s299_s11  ;;  %p303_p1 = scmp.lt.u32.totalorder %s299_s11, %s655_s0 }
   0x4   :  { %p305_p2 = pnand %p303_p1, %p300_p0 }
   0x6   :  { %308 = shalt.err (!%p305_p2)  }
   0x7   :  { %s433_s16 = smov [#allocation3]  }
   0x8   :  { %8 = dma.hbm_to_smem %s655_s0, 16, %s433_s16, [#allocation2] }
   0x9   :  { %395 = dma.done.wait [#allocation2], 16 }
   0xa   :  { %396 = vsyncadd [#allocation2], 4294967280 }
   0xb   :  { %10 = sfence }
   0xc   :  { %11 = vsyncpa [#allocation5], 0 }
   0xd   :  { %13 = vsyncpa [#allocation5 + $0x1], 0 }
   0xe   :  { %14 = vsyncpa [#allocation6], 0 }
   0xf   :  { %16 = vsyncpa [#allocation6 + $0x1], 0  ;;  %s463_s19 = smov 0   ;;  %s465_s20 = smov 0  }
  0x10   :  { %s467_s21 = smov 0   ;;  %s469_s22 = smov 0  }
  0x11   :  { %s471_s23 = smov 0   ;;  %s473_s24 = smov 0  }
  0x12   :  { %s475_s0 = smov 0  }
  0x13 LB: > { %s497_s25 = sadd.s32 4294967295, %s431_s0   ;;  %s216_s26 = sadd.s32 4294967294, %s431_s0   ;;  %s431_s0 = sphi %s475_s0, %s675_s0   ;;  %s427_s24 = sphi %s473_s24, %s674_s24   ;;  %s423_s23 = sphi %s471_s23, %s673_s23   ;;  %s419_s22 = sphi %s469_s22, %s672_s22   ;;  %s415_s21 = sphi %s467_s21, %s671_s21   ;;  %s411_s20 = sphi %s465_s20, %s670_s20   ;;  %s407_s19 = sphi %s463_s19, %s669_s19  }
  0x14   : > { %s501_s27 = sadd.s32 1, %s431_s0   ;;  %s26_s28 = sld [smem:[#allocation3 + %s431_s0]] }
  0x15   : > { %s27_s29 = sld [smem:[#allocation3 + %s501_s27]]  ;;  %s31_s30 = sadd.s32 1, %s427_s24 }
  0x16   : > { %p38_p3 = scmp.ne.s32.totalorder %s427_s24, %s423_s23  ;;  %p39_p4 = scmp.eq.s32.totalorder %s431_s0, 0 }
  0x17   : > { %p44_p5 = scmp.ne.s32.totalorder %s423_s23, %s419_s22  ;;  %p45_p6 = scmp.eq.s32.totalorder %s497_s25, 0 }
  0x18   : > { %p511_p7 = por %p39_p4, %p38_p3  ;;  %s54_s4 = ssub.s32 %s431_s0, %s501_s27 }
  0x19   : > { %p517_p8 = por %p45_p6, %p44_p5  ;;  %p55_p9 = scmp.eq.s32.totalorder %s54_s4, 0 }
  0x1a   : > { %s57_s6 = sadd.s32 1, %s415_s21  ;;  %p67_p10 = scmp.ne.s32.totalorder %s415_s21, %s411_s20 }
  0x1b   : > { %s661_s5 = scalar_select %p517_p8, 1, 0 }
  0x1c   : > { %s28_s7 = ssub.s32 %s26_s28, %s27_s29  ;;  %p68_p11 = scmp.eq.s32.totalorder %s497_s25, 7 }
  0x1d   : > { %p29_p12 = scmp.eq.s32.totalorder %s28_s7, 0  ;;  %p73_p13 = scmp.ne.s32.totalorder %s411_s20, %s407_s19 }
  0x1e   : > { %s528_s8 = scalar_select %p55_p9, %s415_s21, %s57_s6  }
  0x1f   : > { %s531_s9 = scalar_select %p29_p12, %s427_s24, %s31_s30  }
  0x20   : > { %p533_p0 = por %p68_p11, %p67_p10  ;;  %p74_p1 = scmp.eq.s32.totalorder %s216_s26, 7 }
  0x21   : > { %p240_p3 = scmp.lt.s32.totalorder %s431_s0, 8  ;;  %s94_s12 = sand.u32 1, %s427_s24  }
  0x22   : > { %s662_s10 = scalar_select %p533_p0, 1, 0 }
  0x23   : > { %p537_p2 = por %p74_p1, %p73_p13  ;;  %p550_p4 = pnand %p240_p3, %p511_p7 }
  0x24   : > { %s224_s13 = scalar_select %p511_p7, [#allocation3], [#allocation8] }
  0x25   : > { %s663_s11 = scalar_select %p537_p2, 1, 0 }
  0x26   : > { %s225_s14 = scalar_select %p511_p7, %s431_s0, 0 }
  0x27   : > { %s677_s13 = smov (!%p240_p3, %s224_s13), [#allocation9]  ;;  %p220_p5 = scmp.ge.s32.totalorder %s431_s0, 1 }
  0x28   : > { %s679_s14 = smov (!%p240_p3, %s225_s14), 0  ;;  %s97_s17 = scalar_lea.vmem [#allocation4], %s94_s12 }
  0x29   : > { %s98_s16 = sld [smem:[%s677_s13 + %s679_s14]]  ;;  %s105_s18 = sshll.u32 %s97_s17, 4  ;;  %s560_s18 = int_to_ptr.vmem [resolvable:$true] %s105_s18 }
  0x2a   : > { %p110_p6 = scmp.lt.s32.totalorder %s431_s0, 9  ;;  %s95_s3 = scalar_lea.sflag [#allocation5], %s94_s12 }
  0x2b   : > { %p311_p10 = pneg %p550_p4  ;;  %s314_s13 = scalar_lea.hbm %s656_s1, 256 }
  0x2c   : > { %p556_p9 = pnand %p220_p5, %p110_p6 }
  0x2f   : > { %s219_s26 = sshll.u32 %s98_s16, 4 }
  0x30   : > { %s565_s30 = scalar_lea.hbm %s656_s1, %s219_s26 }
  0x31   : > { %s309_s4 = scalar_lea.hbm %s565_s30, 16  ;;  %p315_p13 = scmp.lt.u32.totalorder %s565_s30, %s656_s1 }
  0x32   : > { %p310_p7 = scmp.ne.s32.totalorder %s565_s30, %s309_s4  ;;  %p316_p1 = scmp.lt.u32.totalorder %s314_s13, %s309_s4 }
  0x33   : > { %p318_p5 = scmp.lt.u32.totalorder %s309_s4, %s565_s30 }
  0x34   : > { %p312_p11 = pnand %p311_p10, %p310_p7  ;;  %p317_p3 = por %p316_p1, %p315_p13 }
  0x36   : > { %p313_p12 = pneg %p312_p11  ;;  %p319_p6 = por %p318_p5, %p317_p3 }
  0x38   : > { %p320_p2 = pnand %p319_p6, %p313_p12 }
  0x3a   : > { %323 = shalt.err (!%p320_p2)
}
  0x3b   : > { %s324_s12 = scalar_lea.vmem %s560_s18, 16  ;;  %s434_s17 = smov [#allocation4]  }
  0x3c   : > { %p325_p7 = scmp.ne.s32.totalorder %s560_s18, %s324_s12  ;;  %s329_s26 = sshll.u32 %s434_s17, 4  ;;  %s330_s26 = int_to_ptr.vmem [resolvable:$false] %s329_s26 }
  0x3d   : > { %s331_s28 = scalar_lea.vmem %s330_s26, 32  ;;  %p332_p8 = scmp.lt.s32.totalorder %s560_s18, %s330_s26 }
  0x3e   : > { %p327_p11 = pnand %p325_p7, %p311_p10  ;;  %p333_p13 = scmp.lt.s32.totalorder %s331_s28, %s324_s12 }
  0x40   : > { %p328_p0 = pneg %p327_p11  ;;  %p334_p1 = por %p333_p13, %p332_p8 }
  0x42   : > { %p335_p3 = pnand %p334_p1, %p328_p0 }
  0x44   : > { %338 = shalt.err (!%p335_p3)
}
  0x45   : > { %235 = dma.hbm_to_vmem [thread:$0]  (!%p550_p4), %s565_s30, 16, %s560_s18, %s95_s3  }
  0x46   : > { %114 = sbr.rel (%p556_p9) target bundleno = 104 (0x68), region = 24  ;;  %s116_s29 = sand.u32 (!%p556_p9), 1, %s423_s23  }
  0x47   : > { %s117_s4 = scalar_lea.sflag (!%p556_p9), [#allocation5], %s116_s29  ;;  %s119_s6 = scalar_lea.vmem (!%p556_p9), [#allocation4], %s116_s29 }
  0x48   : > { %p666_p2 = scmp.ne.s32.totalorder (!%p556_p9), %s661_s5, 0 }
  0x4d   : > { %398 = dma.done.wait (%p666_p2), %s117_s4, 16  }
  0x4e   : > { %400 = vsyncadd (%p666_p2), %s117_s4, 4294967280  ;;  %s134_s15 = sand.u32 1, %s411_s20   ;;  %s221_s18 = sshll.u32 %s497_s25, 4  ;;  %vm138_vm0 = vcmask 253952   ;;  %v137_v0 = vld [vmem:[%s119_s6] sm:$0x1] }
  0x4f   : > { %s135_s7 = scalar_lea.vmem [#allocation7], %s134_s15  ;;  %s606_s3 = scalar_lea.hbm %s657_s2, %s221_s18 }
  0x50   : > { %s153_s13 = sshll.u32 %s135_s7, 4  ;;  %139 = vst.msk [vmem:[%s135_s7] sm:$0x1] %vm138_vm0, %v137_v0  ;;  %s141_s5 = scalar_lea.sflag [#allocation6], %s134_s15  ;;  %s601_s13 = int_to_ptr.vmem [resolvable:$true] %s153_s13 }
  0x51   : > { %s339_s14 = scalar_lea.vmem %s601_s13, 16  ;;  %p667_p0 = scmp.ne.s32.totalorder %s662_s10, 0 }
  0x52   : > { %p340_p8 = scmp.ne.s32.totalorder %s601_s13, %s339_s14  ;;  %s435_s25 = smov [#allocation7]  }
  0x53   : > { %s343_s16 = sshll.u32 %s435_s25, 4  ;;  %s344_s16 = int_to_ptr.vmem [resolvable:$false] %s343_s16 }
  0x54   : > { %p341_p4 = pnand %p340_p8, %p667_p0  ;;  %s345_s12 = scalar_lea.vmem %s344_s16, 32 }
  0x55   : > { %p346_p10 = scmp.lt.s32.totalorder %s601_s13, %s344_s16  ;;  %p347_p12 = scmp.lt.s32.totalorder %s345_s12, %s339_s14 }
  0x56   : > { %p342_p9 = pneg %p341_p4 }
  0x57   : > { %p348_p5 = por %p347_p12, %p346_p10 }
  0x59   : > { %p349_p6 = pnand %p348_p5, %p342_p9 }
  0x5b   : > { %352 = shalt.err (!%p349_p6)
}
  0x5c   : > { %s353_s17 = scalar_lea.hbm %s606_s3, 16  ;;  %s357_s29 = scalar_lea.hbm %s657_s2, 128 }
  0x5d   : > { %p354_p7 = scmp.ne.s32.totalorder %s606_s3, %s353_s17  ;;  %p358_p1 = scmp.lt.u32.totalorder %s606_s3, %s657_s2 }
  0x5e   : > { %p359_p3 = scmp.lt.u32.totalorder %s357_s29, %s353_s17  ;;  %p361_p8 = scmp.lt.u32.totalorder %s353_s17, %s606_s3 }
  0x5f   : > { %p355_p11 = pnand %p354_p7, %p667_p0 }
  0x60   : > { %p360_p2 = por %p359_p3, %p358_p1 }
  0x61   : > { %p356_p13 = pneg %p355_p11 }
  0x62   : > { %p362_p4 = por %p361_p8, %p360_p2 }
  0x64   : > { %p363_p9 = pnand %p362_p4, %p356_p13 }
  0x66   : > { %366 = shalt.err (!%p363_p9)
}
  0x67   : > { %228 = dma.vmem_to_hbm [thread:$0]  (%p667_p0), %s601_s13, 16, %s606_s3, %s141_s5  }
  0x68 PF: > { %p241_p10 = scmp.ge.s32.totalorder %s431_s0, 2  ;;  %s165_s15 = sand.u32 1, %s407_s19  }
  0x69   : > { %p668_p12 = scmp.ne.s32.totalorder %s663_s11, 0  ;;  %s166_s7 = scalar_lea.sflag [#allocation6], %s165_s15 }
  0x6b   : > { %p237_p5 = pnand %p241_p10, %p668_p12 }
  0x6d   : > { %402 = dma.done.wait (!%p237_p5), %s166_s7, 16  }
  0x6e   : > { %404 = vsyncadd (!%p237_p5), %s166_s7, 4294967280  ;;  %p19_p0 = scmp.ge.s32.totalorder %s501_s27, 10   ;;  %s669_s19 = smov %s411_s20 }
  0x6f   : > { %s670_s20 = smov %s415_s21  ;;  %s671_s21 = smov %s528_s8 }
  0x70   : > { %s672_s22 = smov %s423_s23  ;;  %s673_s23 = smov %s427_s24 }
  0x71   : > { %s674_s24 = smov %s531_s9  ;;  %s675_s0 = smov %s501_s27 }
  0x72   :  { %21 = sbr.rel (!%p19_p0) target bundleno = 19 (0x13), region = 69 }
  0x79   :  { %170 = vsyncpa [#allocation5], 1 }
  0x7a   :  { %172 = vsyncpa [#allocation5 + $0x1], 1 }
  0x7b   :  { %173 = vsyncpa [#allocation6], 1 }
  0x7c   :  { %175 = vsyncpa [#allocation6 + $0x1], 1 }

</bundles_post_ra>
